<compile_context>
chip_gen: v5e
topology: v5e:2x2
jax: 0.10.0
libtpu: 0.0.40
codegen_flags: <defaults>
</compile_context>

<pallas_src>
import math

import jax
import jax.numpy as jnp
from jax.experimental import pallas as pl
from jax.experimental.pallas import tpu as pltpu


def _foldcut_kernel(a_ref, b_ref, o_ref):
    # a_ref / b_ref / o_ref: (bp, br, bc) lane+sublane-dense VMEM tiles.
    o_ref[...] = a_ref[...] + b_ref[...]


def _pick_block(extent: int, target: int, quantum: int) -> int:
    """Largest legal block extent: full extent, or a multiple of `quantum` <= target."""
    if extent <= target:
        return extent
    return max(quantum, (target // quantum) * quantum)


def _merged_lane_view(m: int, sub_q: int):
    """Factor the contiguous per-half run of `m` elements as (R, C) with C a
    multiple of 128 (lane-dense).  Prefer the largest C <= 2048 that still
    leaves R >= sub_q (sublane-dense); otherwise C = 128 to maximize R.
    Returns None if m has no multiple-of-128 factor."""
    if m % 128 != 0:
        return None
    start = min(2048, m)
    for c in range(start, 127, -128):
        if m % c == 0 and m // c >= sub_q:
            return (m // c, c)
    return (m // 128, 128)


def foldcut(x: jax.Array, dim: int = 0) -> jax.Array:
    """Equivalent of torch: x1, x2 = x.chunk(2, dim); return x1 + x2."""
    dim = dim % x.ndim
    size = x.shape[dim]
    if size % 2 != 0:
        raise ValueError("Foldcut requires an even extent along `dim`.")
    half = size // 2

    pre = math.prod(x.shape[:dim]) if dim > 0 else 1
    post = math.prod(x.shape[dim + 1:]) if dim + 1 < x.ndim else 1

    itemsize = jnp.dtype(x.dtype).itemsize
    sub_q = max(8, 32 // itemsize)            # sublane quantum (16 bf16, 32 int8)

    # Free contiguous view (pre, 2, R, C); pick (R, C) for lane density.
    if post >= 128:
        R, C = half, post
    else:
        rc = _merged_lane_view(half * post, sub_q)
        R, C = rc if rc is not None else (half, post)
    xv = x.reshape(pre, 2, R, C)

    # Block sizing: ~8 MiB per output block; prefer full-lane rows (bc == C).
    ob_target = (8 * 1024 * 1024) // itemsize
    min_br = R if R < sub_q else sub_q
    bc = _pick_block(C, max(128, ob_target // min_br), 128)
    br = _pick_block(R, max(min_br, ob_target // bc), sub_q)
    bp = min(pre, max(1, ob_target // (bc * br)))

    # v7x megacore: make sure there are >= 2 grid steps when the tensor allows
    # it, so parallel axes shard across both TensorCores.
    def _cdiv(a, b):
        return -(-a // b)

    if _cdiv(pre, bp) == 1 and _cdiv(R, br) == 1 and _cdiv(C, bc) == 1:
        if pre >= 2:
            bp = (pre + 1) // 2
        elif R >= 2 * sub_q:
            br = _cdiv(_cdiv(R, 2), sub_q) * sub_q
        elif C >= 256:
            bc = _cdiv(_cdiv(C, 2), 128) * 128

    grid = (pl.cdiv(pre, bp), pl.cdiv(R, br), pl.cdiv(C, bc))

    # Same array passed twice; only the block index along the size-2 axis
    # differs (0 -> first half, 1 -> second half).  That axis is squeezed out
    # of the kernel refs, so each VMEM tile is a dense (bp, br, bc) slab.
    in_block = (bp, pl.Squeezed(), br, bc)
    out = pl.pallas_call(
        _foldcut_kernel,
        out_shape=jax.ShapeDtypeStruct((pre, R, C), x.dtype),
        grid=grid,
        in_specs=[
            pl.BlockSpec(in_block, lambda p, i, j: (p, 0, i, j)),  # first half
            pl.BlockSpec(in_block, lambda p, i, j: (p, 1, i, j)),  # second half
        ],
        out_specs=pl.BlockSpec((bp, br, bc), lambda p, i, j: (p, i, j)),
        compiler_params=pltpu.CompilerParams(
            dimension_semantics=("parallel", "parallel", "parallel"),
            vmem_limit_bytes=56 * 1024 * 1024,
        ),
    )(xv, xv)

    # Free contiguous reshape back to the original layout with `dim` halved.
    return out.reshape(x.shape[:dim] + (half,) + x.shape[dim + 1:])


def _foldcut_ref(x: jax.Array, dim: int = 0) -> jax.Array:
    x1, x2 = jnp.split(x, 2, axis=dim)
    return x1 + x2


if __name__ == "__main__":
    key = jax.random.PRNGKey(0)
    k0, k1, k2 = jax.random.split(key, 3)
    x = jax.random.normal(k0, (2, 4, 16, 16), dtype=jnp.float32)  # NCHW

    # Module default: dim=0 (fold the batch axis); post >= 128 path + lane split.
    y0 = jax.block_until_ready(foldcut(x, dim=0))
    r0 = _foldcut_ref(x, dim=0)
    assert y0.shape == r0.shape and y0.dtype == r0.dtype
    assert jnp.allclose(y0, r0, atol=1e-6, rtol=1e-6)

    # Channel fold (what parse_layer_args implies: C -> C // 2).
    y1 = jax.block_until_ready(foldcut(x, dim=1))
    r1 = _foldcut_ref(x, dim=1)
    assert y1.shape == r1.shape and y1.dtype == r1.dtype
    assert jnp.allclose(y1, r1, atol=1e-6, rtol=1e-6)

    # Interior dim, post < 128 with no 128-factor -> (half, post) fallback.
    x2 = jax.random.normal(k1, (2, 3, 8, 10), dtype=jnp.float32)
    y2 = jax.block_until_ready(foldcut(x2, dim=2))
    r2 = _foldcut_ref(x2, dim=2)
    assert y2.shape == r2.shape and y2.dtype == r2.dtype
    assert jnp.allclose(y2, r2, atol=1e-6, rtol=1e-6)

    # Last-axis fold (post == 1): merged lane-dense view path + negative dim.
    x3 = jax.random.normal(k2, (2, 4, 8, 2048), dtype=jnp.float32)
    y3 = jax.block_until_ready(foldcut(x3, dim=-1))
    r3 = _foldcut_ref(x3, dim=-1)
    assert y3.shape == r3.shape and y3.dtype == r3.dtype
    assert jnp.allclose(y3, r3, atol=1e-6, rtol=1e-6)

    print("KERNEL_OK")
</pallas_src>

<mosaic_0001>
module attributes {stable_mosaic.version = 11 : i64} {
  func.func @_foldcut_kernel(%arg0: i32, %arg1: i32, %arg2: i32, %arg3: memref<1x1x1x512xf32, #tpu.memory_space<vmem>>, %arg4: memref<1x1x1x512xf32, #tpu.memory_space<vmem>>, %arg5: memref<1x1x512xf32, #tpu.memory_space<vmem>>) attributes {dimension_semantics = [#tpu.dimension_semantics<parallel>, #tpu.dimension_semantics<parallel>, #tpu.dimension_semantics<parallel>], iteration_bounds = array<i64: 1, 1, 2>, scalar_prefetch = 0 : i64, scratch_operands = 0 : i64, tpu.core_type = #tpu.core_type<tc>, window_params = [{transform_indices = @transform_0, window_bounds = array<i64: 1, 1, 1, 512>}, {transform_indices = @transform_1, window_bounds = array<i64: 1, 1, 1, 512>}, {transform_indices = @transform_2, window_bounds = array<i64: 1, 1, 512>}]} {
    %c0 = arith.constant 0 : index
    %c0_0 = arith.constant 0 : index
    %c0_1 = arith.constant 0 : index
    %c0_2 = arith.constant 0 : index
    %0 = vector.load %arg3[%c0, %c0_0, %c0_1, %c0_2] : memref<1x1x1x512xf32, #tpu.memory_space<vmem>>, vector<1x1x1x512xf32>
    %1 = vector.shape_cast %0 : vector<1x1x1x512xf32> to vector<1x1x512xf32>
    %c0_3 = arith.constant 0 : index
    %c0_4 = arith.constant 0 : index
    %c0_5 = arith.constant 0 : index
    %c0_6 = arith.constant 0 : index
    %2 = vector.load %arg4[%c0_3, %c0_4, %c0_5, %c0_6] : memref<1x1x1x512xf32, #tpu.memory_space<vmem>>, vector<1x1x1x512xf32>
    %3 = vector.shape_cast %2 : vector<1x1x1x512xf32> to vector<1x1x512xf32>
    %4 = arith.addf %1, %3 : vector<1x1x512xf32>
    %c0_7 = arith.constant 0 : index
    %c0_8 = arith.constant 0 : index
    %c0_9 = arith.constant 0 : index
    %5 = vector.load %arg5[%c0_7, %c0_8, %c0_9] : memref<1x1x512xf32, #tpu.memory_space<vmem>>, vector<1x1x512xf32>
    tpu.vector_store %arg5[%c0_7, %c0_8, %c0_9], %4 {strides = array<i32>} : memref<1x1x512xf32, #tpu.memory_space<vmem>>, vector<1x1x512xf32>,
    return
  }
  func.func @transform_0(%arg0: i32, %arg1: i32, %arg2: i32) -> (i32, i32, i32, i32) {
    %c0_i32 = arith.constant 0 : i32
    %c0_i32_0 = arith.constant 0 : i32
    return %arg0, %c0_i32, %arg1, %arg2 : i32, i32, i32, i32
  }
  func.func @transform_1(%arg0: i32, %arg1: i32, %arg2: i32) -> (i32, i32, i32, i32) {
    %c1_i32 = arith.constant 1 : i32
    %c0_i32 = arith.constant 0 : i32
    return %arg0, %c1_i32, %arg1, %arg2 : i32, i32, i32, i32
  }
  func.func @transform_2(%arg0: i32, %arg1: i32, %arg2: i32) -> (i32, i32, i32) {
    %c0_i32 = arith.constant 0 : i32
    return %arg0, %arg1, %arg2 : i32, i32, i32
  }
}

</mosaic_0001>

<bundles_post_ra>
// kernel: tpu_custom_call.1
= control target key start
LH: loop header
LB: loop body
LE: loop exit
PB: predicated region body
PF: predicated region fallthrough
CT: control target
= control target key end

     0   :  { %7 = vsyncpa [#allocation3], 0  ;;  %s770_s0 = inlined_call_operand.hbm [shape: f32[1,2,1,1024], index: 0, kind: input, shape index: {}]   ;;  %s771_s1 = inlined_call_operand.hbm [shape: f32[1,2,1,1024], index: 1, kind: input, shape index: {}]   ;;  %s772_s2 = inlined_call_operand.hbm [shape: f32[1,1,1024], index: 2, kind: output, shape index: {}]  }
   0x1   :  { %9 = vsyncpa [#allocation3 + $0x1], 0 }
   0x2   :  { %10 = vsyncpa [#allocation6], 0 }
   0x3   :  { %12 = vsyncpa [#allocation6 + $0x1], 0 }
   0x4   :  { %13 = vsyncpa [#allocation4], 0 }
   0x5   :  { %15 = vsyncpa [#allocation4 + $0x1], 0  ;;  %s634_s9 = smov 0   ;;  %s636_s10 = smov 0  }
   0x6   :  { %s638_s11 = smov 0   ;;  %s640_s12 = smov 0  }
   0x7   :  { %s642_s13 = smov 0   ;;  %s644_s14 = smov 0  }
   0x8 LB: > { %s388_s15 = sadd.s32 4294967295, %s617_s14   ;;  %s389_s16 = sadd.s32 4294967294, %s617_s14   ;;  %s617_s14 = sphi %s644_s14, %s21_s14   ;;  %s613_s13 = sphi %s642_s13, %s782_s13   ;;  %s609_s12 = sphi %s640_s12, %s781_s12   ;;  %s605_s11 = sphi %s638_s11, %s780_s11   ;;  %s601_s10 = sphi %s636_s10, %s779_s10   ;;  %s597_s9 = sphi %s634_s9, %s778_s9  }
   0x9   : > { %s33_s17 = sadd.s32 1, %s613_s13  ;;  %s51_s18 = sadd.s32 1, %s605_s11 }
   0xa   : > { %p34_p0 = scmp.ge.s32.totalorder %s33_s17, 2  ;;  %p58_p1 = scmp.ne.s32.totalorder %s605_s11, %s601_s10 }
   0xb   : > { %p59_p2 = scmp.eq.s32.totalorder %s617_s14, 0  ;;  %p64_p3 = scmp.ne.s32.totalorder %s601_s10, %s597_s9 }
   0xc   : > { %s784_s17 = smov (%p34_p0, %s33_s17), 0  ;;  %p65_p5 = scmp.eq.s32.totalorder %s388_s15, 0 }
   0xd   : > { %p675_p4 = por %p59_p2, %p58_p1  ;;  %s47_s20 = ssub.s32 %s613_s13, %s784_s17 }
   0xe   : > { %p122_p6 = scmp.eq.s32.totalorder %s388_s15, 1  ;;  %p49_p7 = scmp.eq.s32.totalorder %s47_s20, 0 }
   0xf   : > { %p681_p8 = por %p65_p5, %p64_p3  ;;  %p128_p10 = scmp.eq.s32.totalorder %s389_s16, 1 }
  0x10   : > { %p685_p9 = por %p122_p6, %p58_p1  ;;  %p391_p12 = scmp.ge.s32.totalorder %s617_s14, 2 }
  0x11   : > { %s690_s23 = scalar_select %p49_p7, %s605_s11, %s51_s18  }
  0x12   : > { %p692_p11 = por %p128_p10, %p64_p3  ;;  %p421_p13 = scmp.lt.s32.totalorder %s617_s14, 2 }
  0x13   : > { %s148_s25 = sand.u32 1, %s605_s11   ;;  %s393_s27 = sshll.u32 %s613_s13, 2 }
  0x14   : > { %s392_s26 = sshll.u32 %s148_s25, 2  ;;  %s160_s30 = scalar_lea.hbm %s770_s0, %s393_s27 }
  0x15   : > { %s152_s3 = scalar_lea.vmem [#allocation2], %s392_s26  ;;  %s162_s5 = sshll.u32 %s160_s30, 4  ;;  %s163_s5 = int_to_ptr.hbm [resolvable:$true] %s162_s5 }
  0x16   : > { %s164_s4 = sshll.u32 %s152_s3, 4  ;;  %p705_p0 = pnand %p421_p13, %p675_p4  ;;  %s165_s4 = int_to_ptr.vmem [resolvable:$true] %s164_s4 }
  0x17   : > { %p396_p1 = scmp.ge.s32.totalorder %s617_s14, 1  ;;  %p193_p2 = scmp.lt.s32.totalorder %s617_s14, 3 }
  0x18   : > { %s149_s7 = scalar_lea.sflag [#allocation3], %s148_s25  ;;  %s315_s16 = scalar_lea.hbm %s771_s1, %s393_s27 }
  0x19   : > { %413 = dma.hbm_to_vmem [thread:$0]  (!%p705_p0), %s163_s5, 64, %s165_s4, %s149_s7  }
  0x1a   : > { %p194_p3 = pnand %p396_p1, %p193_p2  ;;  %s175_s18 = scalar_lea.vmem [#allocation5], %s392_s26 }
  0x1b   : > { %s188_s20 = sshll.u32 %s175_s18, 4  ;;  %s316_s28 = scalar_lea.hbm %s315_s16, 8  ;;  %s189_s20 = int_to_ptr.vmem [resolvable:$true] %s188_s20 }
  0x1c   : > { %s186_s19 = sshll.u32 %s316_s28, 4  ;;  %s172_s29 = scalar_lea.sflag [#allocation6], %s148_s25  ;;  %s187_s19 = int_to_ptr.hbm [resolvable:$true] %s186_s19 }
  0x1d   : > { %416 = dma.hbm_to_vmem [thread:$0]  (!%p705_p0), %s187_s19, 64, %s189_s20, %s172_s29  }
  0x1e   : > { %197 = sbr.rel (%p194_p3) target bundleno = 53 (0x35), region = 28  ;;  %s719_s30 = sand.u32 (!%p194_p3), 1, %s601_s10  }
  0x1f   : > { %s397_s3 = sshll.u32 (!%p194_p3), %s719_s30, 2  ;;  %s200_s4 = scalar_lea.sflag (!%p194_p3), [#allocation3], %s719_s30 }
  0x20   : > { %s203_s5 = scalar_lea.vmem (!%p194_p3), [#allocation2], %s397_s3 }
  0x23   : > { %584 = dma.done.wait (%p681_p8), %s200_s4, 64  }
  0x24   : > { %586 = vsyncadd (%p681_p8), %s200_s4, 4294967232  ;;  %s210_s25 = scalar_lea.sflag [#allocation6], %s719_s30  ;;  %s213_s26 = scalar_lea.vmem [#allocation5], %s397_s3 }
  0x25   : > { %588 = dma.done.wait (%p681_p8), %s210_s25, 64  }
  0x26   : > { %590 = vsyncadd (%p681_p8), %s210_s25, 4294967232  ;;  %s401_s27 = sshll.u32 %s609_s12, 2  ;;  %v246_v0 = vlaneseq  ;;  %s239_s15 = scalar_lea.vmem [#allocation7], %s397_s3  ;;  %v243_v1 = vld [vmem:[%s203_s5] sm:$0xf] }
  0x27   : > { %s266_s8 = scalar_lea.hbm %s772_s2, %s401_s27  ;;  %s268_s16 = sshll.u32 %s239_s15, 4  ;;  %v244_v2 = vld [vmem:[%s213_s26] sm:$0xf]  ;;  %s269_s16 = int_to_ptr.vmem [resolvable:$true] %s268_s16 }
  0x28   : > { %s270_s18 = sshll.u32 %s266_s8, 4  ;;  %vm248_vm0 = vcmp.lt.s32.totalorder %v246_v0, 512  ;;  %v245_v3 = vadd.f32 %v244_v2, %v243_v1  ;;  %s252_s21 = scalar_lea.sflag [#allocation4], %s719_s30  ;;  %s271_s18 = int_to_ptr.hbm [resolvable:$true] %s270_s18 }
  0x29   : > { %s545_s20 = sshra.s32 %s271_s18, 4  ;;  %s551_s29 = scalar_lea.hbm %s772_s2, 8  ;;  %s546_s20 = int_to_ptr.hbm [resolvable:$true] %s545_s20 }
  0x2a   : > { %250 = vst.msk [vmem:[%s239_s15] sm:$0xf] %vm248_vm0, %v245_v3  ;;  %s547_s12 = scalar_lea.hbm %s546_s20, 4  ;;  %p552_p7 = scmp.lt.s32.totalorder %s546_s20, %s772_s2 }
  0x2b   : > { %p548_p4 = scmp.ne.s32.totalorder %s546_s20, %s547_s12  ;;  %p553_p8 = scmp.lt.s32.totalorder %s551_s29, %s547_s12 }
  0x2d   : > { %p549_p5 = pnand %p548_p4, %p685_p9  ;;  %p554_p10 = por %p553_p8, %p552_p7 }
  0x2f   : > { %p550_p6 = pneg %p549_p5 }
  0x31   : > { %p555_p13 = pnand %p554_p10, %p550_p6 }
  0x33   : > { %558 = shalt.err (!%p555_p13)
}
  0x34   : > { %408 = dma.vmem_to_hbm [thread:$0]  (%p685_p9), %s269_s16, 64, %s271_s18, %s252_s21  }
  0x35 PF: > { %s282_s30 = sand.u32 1, %s597_s9   ;;  %p418_p0 = pnand %p391_p12, %p692_p11 }
  0x36   : > { %s283_s5 = scalar_lea.sflag [#allocation4], %s282_s30 }
  0x37   : > { %p419_p1 = pneg %p418_p0 }
  0x39   : > { %592 = dma.done.wait (%p419_p1), %s283_s5, 64  }
  0x3a   : > { %594 = vsyncadd (%p419_p1), %s283_s5, 4294967232  ;;  %s21_s14 = sadd.s32 1, %s617_s14   ;;  %s778_s9 = smov %s601_s10 }
  0x3b   : > { %p18_p2 = scmp.ge.s32.totalorder %s21_s14, 4   ;;  %s779_s10 = smov %s605_s11 }
  0x3c   : > { %s780_s11 = smov %s690_s23  ;;  %s781_s12 = smov %s613_s13 }
  0x3d   : > { %s782_s13 = smov %s784_s17  ;;  %20 = sbr.rel (!%p18_p2) target bundleno = 8 (0x8), region = 86 }
  0x42   :  { %289 = vsyncpa [#allocation3], 1 }
  0x43   :  { %291 = vsyncpa [#allocation3 + $0x1], 1 }
  0x44   :  { %292 = vsyncpa [#allocation6], 1 }
  0x45   :  { %294 = vsyncpa [#allocation6 + $0x1], 1 }
  0x46   :  { %295 = vsyncpa [#allocation4], 1 }
  0x47   :  { %297 = vsyncpa [#allocation4 + $0x1], 1 }

</bundles_post_ra>
